<compile_context>
chip_gen: v7x
topology: tpu7x:2x2x1
jax: 0.10.0
libtpu: 0.0.40
codegen_flags: <defaults>
</compile_context>

<pallas_src>
import math
from functools import lru_cache

import jax
import jax.numpy as jnp
from jax.experimental import pallas as pl
from jax.experimental.pallas import tpu as pltpu


# -----------------------------------------------------------------------------
# Helpers
# -----------------------------------------------------------------------------

def _round_up(x, m):
    return (x + m - 1) // m * m


def _pad2(x, rows, cols):
    r, c = x.shape
    if r == rows and c == cols:
        return x
    return jnp.pad(x, ((0, rows - r), (0, cols - c)))


def _choose_tiles(M, K, N):
    """Adaptive tile sizes (multiples of 16 / 128, VMEM use < ~2 MiB)."""
    Mr = _round_up(M, 16)                      # 16: bf16 sublane-pack granularity
    tm = min(256, Mr)
    if Mr < 128:
        # Tiny-M late stages: lane-dense wide-N output tiles (full-width stores),
        # capped at 512 so N=1024 layers still give >=2 parallel N blocks (v7x).
        tn = min(_round_up(N, 128), 512)
    else:
        tn = 256 if N >= 256 else _round_up(N, 128)
    # Pick the largest tk in {512,384,256,128} dividing the 128-aligned K
    # (no extra K zero-padding beyond lane alignment, few grid steps).
    Kp = _round_up(K, 128)
    tk = 128
    for cand in (512, 384, 256):
        if Kp % cand == 0:
            tk = cand
            break
    return tm, tk, tn


# -----------------------------------------------------------------------------
# Pallas kernels: tiled bf16 matmul + bias + Mish (+ residual / dual-input)
# -----------------------------------------------------------------------------

def _mish(z):
    # Mish(z) = z * tanh(softplus(z)); tanh(softplus(z)) = ((1+e^z)^2-1)/((1+e^z)^2+1)
    # Clamp: for z >= 20, tanh(softplus(z)) == 1.0 to f32 precision, so the
    # clamp is exact and prevents exp overflow.  One EUP exp + one approx vrcp.
    t = jnp.exp(jnp.minimum(z, 20.0))
    u = (1.0 + t) * (1.0 + t)
    return z * ((u - 1.0) * pl.reciprocal(u + 1.0, approx=True))


def _conv_kernel(a_ref, b_ref, c_ref, o_ref, acc_ref):
    k = pl.program_id(2)

    @pl.when(k == 0)
    def _():
        acc_ref[...] = jnp.zeros_like(acc_ref)

    acc_ref[...] += jnp.dot(a_ref[...], b_ref[...],
                            preferred_element_type=jnp.float32)

    @pl.when(k == pl.num_programs(2) - 1)
    def _():
        z = acc_ref[...] + c_ref[...]            # BN scale folded into weights
        o_ref[...] = _mish(z).astype(o_ref.dtype)


def _conv_res_kernel(a_ref, b_ref, c_ref, r_ref, o_ref, acc_ref):
    k = pl.program_id(2)

    @pl.when(k == 0)
    def _():
        acc_ref[...] = jnp.zeros_like(acc_ref)

    acc_ref[...] += jnp.dot(a_ref[...], b_ref[...],
                            preferred_element_type=jnp.float32)

    @pl.when(k == pl.num_programs(2) - 1)
    def _():
        z = acc_ref[...] + c_ref[...]
        o_ref[...] = (_mish(z) + r_ref[...].astype(jnp.float32)).astype(o_ref.dtype)


def _concat_conv_kernel(a1_ref, b1_ref, a2_ref, b2_ref, c_ref, o_ref, acc_ref):
    # Fused torch.cat([x1, x0], channel) + 1x1 conv: two K-streams into one acc.
    k = pl.program_id(2)

    @pl.when(k == 0)
    def _():
        acc_ref[...] = jnp.zeros_like(acc_ref)

    acc_ref[...] += jnp.dot(a1_ref[...], b1_ref[...],
                            preferred_element_type=jnp.float32)
    acc_ref[...] += jnp.dot(a2_ref[...], b2_ref[...],
                            preferred_element_type=jnp.float32)

    @pl.when(k == pl.num_programs(2) - 1)
    def _():
        z = acc_ref[...] + c_ref[...]
        o_ref[...] = _mish(z).astype(o_ref.dtype)


@lru_cache(maxsize=None)
def _get_conv_call(Mp, Kp, Np, tm, tk, tn, kind):
    a_spec = pl.BlockSpec((tm, tk), lambda i, j, k: (i, k))
    b_spec = pl.BlockSpec((tk, tn), lambda i, j, k: (k, j))
    bias_spec = pl.BlockSpec((1, tn), lambda i, j, k: (0, j))
    out_spec = pl.BlockSpec((tm, tn), lambda i, j, k: (i, j))

    if kind == "plain":
        kernel = _conv_kernel
        in_specs = [a_spec, b_spec, bias_spec]
    elif kind == "res":
        kernel = _conv_res_kernel
        in_specs = [a_spec, b_spec, bias_spec,
                    pl.BlockSpec((tm, tn), lambda i, j, k: (i, j))]
    else:  # "concat"
        kernel = _concat_conv_kernel
        in_specs = [a_spec, b_spec, a_spec, b_spec, bias_spec]

    return pl.pallas_call(
        kernel,
        out_shape=jax.ShapeDtypeStruct((Mp, Np), jnp.bfloat16),
        grid=(Mp // tm, Np // tn, Kp // tk),
        in_specs=in_specs,
        out_specs=out_spec,
        scratch_shapes=[pltpu.VMEM((tm, tn), jnp.float32)],
        compiler_params=pltpu.CompilerParams(
            dimension_semantics=("parallel", "parallel", "arbitrary"),
            vmem_limit_bytes=32 * 1024 * 1024),
    )


def matmul_bn_mish(a, b_bf16, bias, residual=None):
    """out = mish(a @ b + bias) (+ residual); bf16 operands, f32 accumulation."""
    M, K = a.shape
    _, Nc = b_bf16.shape
    tm, tk, tn = _choose_tiles(M, K, Nc)
    Mp, Kp, Np = _round_up(M, tm), _round_up(K, tk), _round_up(Nc, tn)

    a_p = _pad2(a.astype(jnp.bfloat16), Mp, Kp)
    b_p = _pad2(b_bf16, Kp, Np)
    c_p = _pad2(bias.reshape(1, Nc).astype(jnp.float32), 1, Np)

    args = [a_p, b_p, c_p]
    kind = "plain"
    if residual is not None:
        args.append(_pad2(residual.astype(jnp.bfloat16), Mp, Np))
        kind = "res"

    out = _get_conv_call(Mp, Kp, Np, tm, tk, tn, kind)(*args)
    return out[:M, :Nc]


def matmul2_bn_mish(a1, b1_bf16, a2, b2_bf16, bias):
    """out = mish(a1 @ b1 + a2 @ b2 + bias)  (fused concat + 1x1 conv)."""
    M, K = a1.shape
    _, Nc = b1_bf16.shape
    tm, tk, tn = _choose_tiles(M, K, Nc)
    Mp, Kp, Np = _round_up(M, tm), _round_up(K, tk), _round_up(Nc, tn)

    a1_p = _pad2(a1.astype(jnp.bfloat16), Mp, Kp)
    a2_p = _pad2(a2.astype(jnp.bfloat16), Mp, Kp)
    b1_p = _pad2(b1_bf16, Kp, Np)
    b2_p = _pad2(b2_bf16, Kp, Np)
    c_p = _pad2(bias.reshape(1, Nc).astype(jnp.float32), 1, Np)

    out = _get_conv_call(Mp, Kp, Np, tm, tk, tn, "concat")(
        a1_p, b1_p, a2_p, b2_p, c_p)
    return out[:M, :Nc]


# -----------------------------------------------------------------------------
# BasicConv = Conv2d(k, stride, pad=k//2, bias=False) + BN + Mish
# -----------------------------------------------------------------------------

_BN_EPS = 1e-5


def _folded_bn(p):
    scale = p["gamma"] / jnp.sqrt(p["var"] + _BN_EPS)
    bias = p["beta"] - p["mean"] * scale
    return scale, bias


def basic_conv_fwd(p, x, stride=1, residual=None):
    """x: (N, H, W, Cin) NHWC (bf16) -> (N, Ho, Wo, Cout) NHWC (bf16)."""
    w = p["w"]                                  # (k, k, Cin, Cout), f32
    kk, cout = w.shape[0], w.shape[3]
    N, H, W, Cin = x.shape

    scale, bias = _folded_bn(p)
    # Fold BN scale into the weight matrix (tiny one-time op per layer).
    bmat = (w.reshape(kk * kk * Cin, cout) * scale[None, :]).astype(jnp.bfloat16)

    if kk == 1 and stride == 1:
        # 1x1 conv: plain reshape, no im2col.
        a = x.reshape(N * H * W, Cin)
        Ho, Wo = H, W
    else:
        pad = kk // 2
        x_pad = jnp.pad(x, ((0, 0), (pad, pad), (pad, pad), (0, 0)))
        Hp, Wp = H + 2 * pad, W + 2 * pad
        Ho = (Hp - kk) // stride + 1
        Wo = (Wp - kk) // stride + 1
        # TODO(synk): implicit GEMM (in-kernel strided patch DMA) would avoid
        # writing the kxk-expanded im2col matrix through HBM for 3x3 layers.
        pats = [x_pad[:, kh:kh + stride * (Ho - 1) + 1:stride,
                      kw:kw + stride * (Wo - 1) + 1:stride, :]
                for kh in range(kk) for kw in range(kk)]
        a = jnp.stack(pats, axis=3).reshape(N * Ho * Wo, kk * kk * Cin)

    res = None if residual is None else residual.reshape(N * Ho * Wo, cout)
    y = matmul_bn_mish(a, bmat, bias, residual=res)
    return y.reshape(N, Ho, Wo, cout)


def concat_conv_fwd(p, x1, x0):
    """Fused torch.cat([x1, x0], dim=channel) + 1x1 BasicConv (no concat in HBM)."""
    w = p["w"]                                  # (1, 1, 2C, Cout)
    c2, cout = w.shape[2], w.shape[3]
    C = c2 // 2
    N, H, W, _ = x1.shape
    M = N * H * W

    scale, bias = _folded_bn(p)
    bfull = w.reshape(c2, cout) * scale[None, :]
    b1 = bfull[:C].astype(jnp.bfloat16)         # rows for x1's channels
    b2 = bfull[C:].astype(jnp.bfloat16)         # rows for x0's channels

    y = matmul2_bn_mish(x1.reshape(M, C), b1, x0.reshape(M, C), b2, bias)
    return y.reshape(N, H, W, cout)


# -----------------------------------------------------------------------------
# Parameter initialisation (deterministic, mirrors the PyTorch __init__)
# -----------------------------------------------------------------------------

class _Keys:
    def __init__(self, key):
        self._key = key

    def next(self):
        self._key, sub = jax.random.split(self._key)
        return sub


def init_basic_conv(keys, cin, cout, k):
    std = math.sqrt(2.0 / (k * k * cout))          # normal_(0, sqrt(2/n))
    w = jax.random.normal(keys.next(), (k, k, cin, cout), jnp.float32) * std
    return {
        "w": w,
        "gamma": jnp.ones((cout,), jnp.float32),   # BN weight = 1
        "beta": jnp.zeros((cout,), jnp.float32),   # BN bias = 0
        "mean": jnp.zeros((cout,), jnp.float32),   # running_mean = 0
        "var": jnp.ones((cout,), jnp.float32),     # running_var = 1
    }


def init_resblock(keys, channels, hidden=None):
    if hidden is None:
        hidden = channels
    return {
        "c1": init_basic_conv(keys, channels, hidden, 1),
        "c2": init_basic_conv(keys, hidden, channels, 3),
    }


def init_resblock_body(keys, cin, cout, num_blocks, first):
    p = {"down": init_basic_conv(keys, cin, cout, 3)}
    if first:
        p["split0"] = init_basic_conv(keys, cout, cout, 1)
        p["split1"] = init_basic_conv(keys, cout, cout, 1)
        p["blocks"] = [init_resblock(keys, cout, cout // 2)]
        p["tail"] = init_basic_conv(keys, cout, cout, 1)
        p["concat"] = init_basic_conv(keys, cout * 2, cout, 1)
    else:
        p["split0"] = init_basic_conv(keys, cout, cout // 2, 1)
        p["split1"] = init_basic_conv(keys, cout, cout // 2, 1)
        p["blocks"] = [init_resblock(keys, cout // 2) for _ in range(num_blocks)]
        p["tail"] = init_basic_conv(keys, cout // 2, cout // 2, 1)
        p["concat"] = init_basic_conv(keys, cout, cout, 1)
    return p


def init_cspdarknet(key, layers):
    keys = _Keys(key)
    inplanes = 32
    feature_channels = [64, 128, 256, 512, 1024]
    params = {"conv1": init_basic_conv(keys, 3, inplanes, 3)}
    cins = [inplanes] + feature_channels[:-1]
    params["stages"] = [
        init_resblock_body(keys, cins[i], feature_channels[i], layers[i],
                           first=(i == 0))
        for i in range(5)
    ]
    return params


# -----------------------------------------------------------------------------
# Forward pass (mirrors the PyTorch forward exactly)
# -----------------------------------------------------------------------------

def resblock_fwd(p, x):
    h = basic_conv_fwd(p["c1"], x, stride=1)
    # x + block(x): the residual add is fused into the 3x3 conv's epilogue.
    return basic_conv_fwd(p["c2"], h, stride=1, residual=x)


def resblock_body_fwd(p, x):
    x = basic_conv_fwd(p["down"], x, stride=2)
    x0 = basic_conv_fwd(p["split0"], x)
    x1 = basic_conv_fwd(p["split1"], x)
    for rb in p["blocks"]:
        x1 = resblock_fwd(rb, x1)
    x1 = basic_conv_fwd(p["tail"], x1)
    # torch.cat([x1, x0], dim=1) + concat_conv, fused into one kernel.
    return concat_conv_fwd(p["concat"], x1, x0)


def cspdarknet_fwd(params, x_nchw):
    x = jnp.transpose(x_nchw, (0, 2, 3, 1)).astype(jnp.bfloat16)  # NCHW -> NHWC
    x = basic_conv_fwd(params["conv1"], x)
    x = resblock_body_fwd(params["stages"][0], x)
    x = resblock_body_fwd(params["stages"][1], x)
    out3 = resblock_body_fwd(params["stages"][2], x)
    out4 = resblock_body_fwd(params["stages"][3], out3)
    out5 = resblock_body_fwd(params["stages"][4], out4)
    to_nchw = lambda t: jnp.transpose(t, (0, 3, 1, 2)).astype(jnp.float32)
    return to_nchw(out3), to_nchw(out4), to_nchw(out5)


# -----------------------------------------------------------------------------

if __name__ == "__main__":
    key = jax.random.PRNGKey(0)
    pkey, xkey = jax.random.split(key)

    # Small layer config / spatial size; channel structure fixed by the module.
    layers = [1, 1, 1, 1, 1]
    params = init_cspdarknet(pkey, layers)

    x = jax.random.normal(xkey, (2, 3, 32, 32), jnp.float32)  # NCHW, like PyTorch

    out3, out4, out5 = cspdarknet_fwd(params, x)
    jax.block_until_ready((out3, out4, out5))

    assert out3.shape == (2, 256, 4, 4), out3.shape
    assert out4.shape == (2, 512, 2, 2), out4.shape
    assert out5.shape == (2, 1024, 1, 1), out5.shape
    assert jnp.all(jnp.isfinite(out3)) and jnp.all(jnp.isfinite(out4)) and jnp.all(jnp.isfinite(out5))

    print("KERNEL_OK")
</pallas_src>

<mosaic_0001>
module attributes {stable_mosaic.version = 11 : i64} {
  func.func @_conv_kernel(%arg0: i32, %arg1: i32, %arg2: i32, %arg3: memref<256x128xbf16, #tpu.memory_space<vmem>>, %arg4: memref<128x128xbf16, #tpu.memory_space<vmem>>, %arg5: memref<1x128xf32, #tpu.memory_space<vmem>>, %arg6: memref<256x128xbf16, #tpu.memory_space<vmem>>, %arg7: memref<256x128xf32, #tpu.memory_space<vmem>>) attributes {dimension_semantics = [#tpu.dimension_semantics<parallel>, #tpu.dimension_semantics<parallel>, #tpu.dimension_semantics<arbitrary>], iteration_bounds = array<i64: 8, 1, 1>, scalar_prefetch = 0 : i64, scratch_operands = 1 : i64, tpu.core_type = #tpu.core_type<tc>, window_params = [{transform_indices = @transform_0, window_bounds = array<i64: 256, 128>}, {transform_indices = @transform_1, window_bounds = array<i64: 128, 128>}, {transform_indices = @transform_2, window_bounds = array<i64: 1, 128>}, {transform_indices = @transform_3, window_bounds = array<i64: 256, 128>}]} {
    %c0_i32 = arith.constant 0 : i32
    %0 = arith.cmpi eq, %arg2, %c0_i32 : i32
    %1 = arith.extui %0 : i1 to i32
    %c0_i32_0 = arith.constant 0 : i32
    %2 = arith.cmpi ne, %1, %c0_i32_0 : i32
    scf.if %2 {
      %cst_10 = arith.constant 0.000000e+00 : f32
      %12 = vector.broadcast %cst_10 : f32 to vector<256x128xf32>
      %c0_11 = arith.constant 0 : index
      %c0_12 = arith.constant 0 : index
      %13 = vector.load %arg7[%c0_11, %c0_12] : memref<256x128xf32, #tpu.memory_space<vmem>>, vector<256x128xf32>
      tpu.vector_store %arg7[%c0_11, %c0_12], %12 {strides = array<i32>} : memref<256x128xf32, #tpu.memory_space<vmem>>, vector<256x128xf32>,
    } else {
    }
    %c0 = arith.constant 0 : index
    %c0_1 = arith.constant 0 : index
    %3 = vector.load %arg7[%c0, %c0_1] : memref<256x128xf32, #tpu.memory_space<vmem>>, vector<256x128xf32>
    %c0_2 = arith.constant 0 : index
    %c0_3 = arith.constant 0 : index
    %4 = vector.load %arg3[%c0_2, %c0_3] : memref<256x128xbf16, #tpu.memory_space<vmem>>, vector<256x128xbf16>
    %c0_4 = arith.constant 0 : index
    %c0_5 = arith.constant 0 : index
    %5 = vector.load %arg4[%c0_4, %c0_5] : memref<128x128xbf16, #tpu.memory_space<vmem>>, vector<128x128xbf16>
    %cst = arith.constant dense<0.000000e+00> : vector<256x128xf32>
    %6 = tpu.matmul %4, %5, %cst {dimension_numbers = #tpu.dot_dimension_numbers<[1], [0], [0], [1], [0, 0, 1, 1], [], []>} : vector<256x128xbf16>, vector<128x128xbf16>, vector<256x128xf32> -> vector<256x128xf32>
    %7 = arith.addf %3, %6 : vector<256x128xf32>
    %c0_6 = arith.constant 0 : index
    %c0_7 = arith.constant 0 : index
    %8 = vector.load %arg7[%c0_6, %c0_7] : memref<256x128xf32, #tpu.memory_space<vmem>>, vector<256x128xf32>
    tpu.vector_store %arg7[%c0_6, %c0_7], %7 {strides = array<i32>} : memref<256x128xf32, #tpu.memory_space<vmem>>, vector<256x128xf32>,
    %c0_i32_8 = arith.constant 0 : i32
    %9 = arith.cmpi eq, %arg2, %c0_i32_8 : i32
    %10 = arith.extui %9 : i1 to i32
    %c0_i32_9 = arith.constant 0 : i32
    %11 = arith.cmpi ne, %10, %c0_i32_9 : i32
    scf.if %11 {
      %c0_10 = arith.constant 0 : index
      %c0_11 = arith.constant 0 : index
      %12 = vector.load %arg7[%c0_10, %c0_11] : memref<256x128xf32, #tpu.memory_space<vmem>>, vector<256x128xf32>
      %c0_12 = arith.constant 0 : index
      %c0_13 = arith.constant 0 : index
      %13 = vector.load %arg5[%c0_12, %c0_13] : memref<1x128xf32, #tpu.memory_space<vmem>>, vector<1x128xf32>
      %14 = vector.broadcast %13 : vector<1x128xf32> to vector<256x128xf32>
      %15 = arith.addf %12, %14 : vector<256x128xf32>
      %cst_14 = arith.constant 2.000000e+01 : f32
      %16 = vector.broadcast %cst_14 : f32 to vector<256x128xf32>
      %17 = arith.minimumf %15, %16 : vector<256x128xf32>
      %18 = math.exp %17 : vector<256x128xf32>
      %cst_15 = arith.constant 1.000000e+00 : f32
      %19 = vector.broadcast %cst_15 : f32 to vector<256x128xf32>
      %20 = arith.addf %19, %18 : vector<256x128xf32>
      %cst_16 = arith.constant 1.000000e+00 : f32
      %21 = vector.broadcast %cst_16 : f32 to vector<256x128xf32>
      %22 = arith.addf %21, %18 : vector<256x128xf32>
      %23 = arith.mulf %20, %22 : vector<256x128xf32>
      %cst_17 = arith.constant 1.000000e+00 : f32
      %24 = vector.broadcast %cst_17 : f32 to vector<256x128xf32>
      %25 = arith.subf %23, %24 : vector<256x128xf32>
      %cst_18 = arith.constant 1.000000e+00 : f32
      %26 = vector.broadcast %cst_18 : f32 to vector<256x128xf32>
      %27 = arith.addf %23, %26 : vector<256x128xf32>
      %28 = tpu.reciprocal %27 {approx = true} : vector<256x128xf32> -> vector<256x128xf32>
      %29 = arith.mulf %25, %28 : vector<256x128xf32>
      %30 = arith.mulf %15, %29 : vector<256x128xf32>
      %31 = arith.truncf %30 : vector<256x128xf32> to vector<256x128xbf16>
      %c0_19 = arith.constant 0 : index
      %c0_20 = arith.constant 0 : index
      %32 = vector.load %arg6[%c0_19, %c0_20] : memref<256x128xbf16, #tpu.memory_space<vmem>>, vector<256x128xbf16>
      tpu.vector_store %arg6[%c0_19, %c0_20], %31 {strides = array<i32>} : memref<256x128xbf16, #tpu.memory_space<vmem>>, vector<256x128xbf16>,
    } else {
    }
    return
  }
  func.func @transform_0(%arg0: i32, %arg1: i32, %arg2: i32) -> (i32, i32) {
    %c0_i32 = arith.constant 0 : i32
    return %arg0, %arg2 : i32, i32
  }
  func.func @transform_1(%arg0: i32, %arg1: i32, %arg2: i32) -> (i32, i32) {
    %c0_i32 = arith.constant 0 : i32
    return %arg2, %arg1 : i32, i32
  }
  func.func @transform_2(%arg0: i32, %arg1: i32, %arg2: i32) -> (i32, i32) {
    %c0_i32 = arith.constant 0 : i32
    %c0_i32_0 = arith.constant 0 : i32
    return %c0_i32, %arg1 : i32, i32
  }
  func.func @transform_3(%arg0: i32, %arg1: i32, %arg2: i32) -> (i32, i32) {
    %c0_i32 = arith.constant 0 : i32
    return %arg0, %arg1 : i32, i32
  }
}

</mosaic_0001>

<bundles_post_ra>
// kernel: tpu_custom_call.1
= control target key start
LH: loop header
LB: loop body
LE: loop exit
PB: predicated region body
PF: predicated region fallthrough
CT: control target
= control target key end

     0   :  { %8 = vsyncpa [#allocation4], 0  ;;  %s2653_s0 = inlined_call_operand.hbm [shape: bf16[2048,128], index: 0, kind: input, shape index: {}]   ;;  %s2654_s1 = inlined_call_operand.hbm [shape: bf16[128,128], index: 1, kind: input, shape index: {}]   ;;  %s2655_s2 = inlined_call_operand.vmem [shape: f32[1,128], index: 2, kind: input, shape index: {}]   ;;  %s2656_s3 = inlined_call_operand.hbm [shape: bf16[2048,128], index: 3, kind: output, shape index: {}]  }
   0x1   :  { %10 = vsyncpa [#allocation4 + $0x1], 0 }
   0x2   :  { %11 = vsyncpa [#allocation7], 0 }
   0x3   :  { %12 = vsyncpa [#allocation5], 0 }
   0x4   :  { %14 = vsyncpa [#allocation5 + $0x1], 0  ;;  %s2151_s12 = smov 0   ;;  %s2153_s13 = smov 0  }
   0x5   :  { %s2155_s14 = smov 0   ;;  %s2157_s15 = smov 0  }
   0x6   :  { %s2159_s16 = smov 0   ;;  %s2161_s17 = smov 0  }
   0x7 LB: > { %s1425_s18 = sadd.s32 4294967295, %s2122_s17   ;;  %s1426_s19 = sadd.s32 4294967294, %s2122_s17   ;;  %s2122_s17 = sphi %s2161_s17, %s20_s17   ;;  %s2118_s16 = sphi %s2159_s16, %s2693_s16   ;;  %s2114_s15 = sphi %s2157_s15, %s2692_s15   ;;  %s2110_s14 = sphi %s2155_s14, %s2691_s14   ;;  %s2106_s13 = sphi %s2153_s13, %s2690_s13   ;;  %s2102_s12 = sphi %s2151_s12, %s2689_s12  }
   0x8   : > { %p61_p0 = scmp.ne.s32.totalorder %s2106_s13, %s2102_s12  ;;  %p2185_p1 = scmp.eq.s32.totalorder %s1425_s18, 0 }
   0x9   : > { %p2189_p2 = scmp.eq.s32.totalorder %s1425_s18, 7  ;;  %p147_p3 = scmp.eq.s32.totalorder %s1426_s19, 7 }
   0xa   : > { %s2663_s20 = scalar_select %p2185_p1, 1, 0 }
   0xb   : > { %s2664_s21 = scalar_select %p2189_p2, 1, 0 }
   0xc   : > { %p2195_p4 = por %p2185_p1, %p61_p0  ;;  %p1427_p5 = scmp.ge.s32.totalorder %s2122_s17, 1 }
   0xd   : > { %p2200_p6 = por %p147_p3, %p61_p0  ;;  %p154_p7 = scmp.lt.s32.totalorder %s2122_s17, 9 }
   0xe   : > { %s2665_s22 = scalar_select %p2195_p4, 1, 0 }
   0xf   : > { %s2666_s23 = scalar_select %p2200_p6, 1, 0 }
  0x10   : > { %p2205_p8 = pnand %p1427_p5, %p154_p7  ;;  %s2124_s25 = smov [#allocation6]  }
  0x11   : > { %s170_s26 = sshll.u32 %s2124_s25, 4  ;;  %s39_s28 = sadd.s32 1, %s2118_s16  ;;  %s171_s26 = int_to_ptr.vmem [resolvable:$true] %s170_s26 }
  0x12   : > { %s2667_s24 = scalar_select %p2205_p8, 1, 0 }
  0x13   : > { %p1757_p9 = pneg %p2205_p8  ;;  %s1978_s4 = scalar_lea.hbm %s2654_s1, 1024 }
  0x14   : > { %p1979_p11 = scmp.ne.s32.totalorder %s2654_s1, %s1978_s4  ;;  %p1985_p3 = scmp.lt.u32.totalorder %s1978_s4, %s2654_s1 }
  0x15   : > { %p2213_p10 = pnand %p1757_p9, %p2185_p1 }
  0x17   : > { %p1980_p12 = pneg %p2213_p10 }
  0x19   : > { %p1981_p13 = pnand %p1980_p12, %p1979_p11 }
  0x1b   : > { %p1982_p0 = pneg %p1981_p13 }
  0x1d   : > { %p1987_p5 = pnand %p1985_p3, %p1982_p0 }
  0x1f   : > { %1990 = shalt.err (!%p1987_p5)
}
  0x20   : > { %s1991_s9 = scalar_lea.vmem %s171_s26, 1024  ;;  %p1999_p1 = scmp.lt.s32.totalorder %s171_s26, %s171_s26 }
  0x21   : > { %p1992_p7 = scmp.ne.s32.totalorder %s171_s26, %s1991_s9  ;;  %p2000_p4 = scmp.lt.s32.totalorder %s1991_s9, %s1991_s9 }
  0x23   : > { %p1994_p9 = pnand %p1992_p7, %p1980_p12  ;;  %p2001_p8 = por %p2000_p4, %p1999_p1 }
  0x25   : > { %p1995_p6 = pneg %p1994_p9 }
  0x27   : > { %p2002_p2 = pnand %p2001_p8, %p1995_p6 }
  0x29   : > { %2005 = shalt.err (!%p2002_p2)
}
  0x2a   : > { %s2125_s10 = smov 64   ;;  %s2126_s11 = smov 4  }
  0x2b   : > { %1760 = dma.hbm_to_vmem [thread:$0]  (!%p2213_p10), %s2654_s1, 1024, %s171_s26, [#allocation7], %s2125_s10, %s2125_s10, %s2126_s11  }
  0x2c   : > { %p41_p1 = scmp.ge.s32.totalorder %s39_s28, 8  ;;  %s48_s25 = sadd.s32 1, %s2110_s14 }
  0x2d   : > { %p55_p2 = scmp.ne.s32.totalorder %s2110_s14, %s2106_s13  ;;  %p56_p4 = scmp.eq.s32.totalorder %s2122_s17, 0 }
  0x2e   : > { %s2695_s28 = smov (%p41_p1, %s39_s28), 0  ;;  %p2670_p8 = scmp.ne.s32.totalorder %s2664_s21, 0 }
  0x2f   : > { %p2243_p6 = por %p56_p4, %p55_p2  ;;  %s43_s30 = ssub.s32 %s2118_s16, %s2695_s28 }
  0x30   : > { %p2249_p11 = por %p2670_p8, %p55_p2  ;;  %p1770_p12 = scmp.lt.s32.totalorder %s2122_s17, 8 }
  0x31   : > { %p46_p10 = scmp.eq.s32.totalorder %s43_s30, 0  ;;  %s190_s26 = sand.u32 1, %s2110_s14  }
  0x32   : > { %s1431_s4 = sshll.u32 %s190_s26, 7  ;;  %s1532_s6 = sshll.u32 %s2118_s16, 11 }
  0x33   : > { %s2258_s5 = scalar_select %p46_p10, %s2110_s14, %s48_s25  }
  0x34   : > { %s2264_s9 = scalar_lea.hbm %s2653_s0, %s1532_s6  ;;  %s194_s21 = scalar_lea.vmem [#allocation3], %s1431_s4 }
  0x35   : > { %s202_s18 = sshll.u32 %s194_s21, 4  ;;  %p2270_p13 = pnand %p1770_p12, %p2243_p6  ;;  %s2266_s18 = int_to_ptr.vmem [resolvable:$true] %s202_s18 }
  0x36   : > { %s2274_s25 = scalar_lea.sflag [#allocation4], %s190_s26  ;;  %s2006_s30 = scalar_lea.hbm %s2264_s9, 2048 }
  0x37   : > { %p2007_p0 = scmp.ne.s32.totalorder %s2264_s9, %s2006_s30  ;;  %p2008_p3 = pneg %p2270_p13 }
  0x38   : > { %s2011_s29 = scalar_lea.hbm %s2653_s0, 16384  ;;  %p2012_p9 = scmp.lt.u32.totalorder %s2264_s9, %s2653_s0 }
  0x39   : > { %p2009_p5 = pnand %p2008_p3, %p2007_p0  ;;  %p2013_p1 = scmp.lt.u32.totalorder %s2011_s29, %s2006_s30 }
  0x3a   : > { %p2015_p4 = scmp.lt.u32.totalorder %s2006_s30, %s2264_s9 }
  0x3b   : > { %p2010_p7 = pneg %p2009_p5  ;;  %p2014_p2 = por %p2013_p1, %p2012_p9 }
  0x3d   : > { %p2016_p6 = por %p2015_p4, %p2014_p2 }
  0x3f   : > { %p2017_p8 = pnand %p2016_p6, %p2010_p7 }
  0x41   : > { %2020 = shalt.err (!%p2017_p8)
}
  0x42   : > { %s2021_s26 = scalar_lea.vmem %s2266_s18, 2048  ;;  %s2127_s21 = smov [#allocation3]  }
  0x43   : > { %p2022_p12 = scmp.ne.s32.totalorder %s2266_s18, %s2021_s26  ;;  %s2026_s4 = sshll.u32 %s2127_s21, 4  ;;  %s2027_s4 = int_to_ptr.vmem [resolvable:$false] %s2026_s4 }
  0x44   : > { %s2028_s6 = scalar_lea.vmem %s2027_s4, 4096  ;;  %p2029_p5 = scmp.lt.s32.totalorder %s2266_s18, %s2027_s4 }
  0x45   : > { %p2024_p10 = pnand %p2022_p12, %p2008_p3  ;;  %p2030_p9 = scmp.lt.s32.totalorder %s2028_s6, %s2021_s26 }
  0x47   : > { %p2025_p0 = pneg %p2024_p10  ;;  %p2031_p1 = por %p2030_p9, %p2029_p5 }
  0x49   : > { %p2032_p2 = pnand %p2031_p1, %p2025_p0 }
  0x4b   : > { %2035 = shalt.err (!%p2032_p2)
}
  0x4c   : > { %1764 = dma.hbm_to_vmem [thread:$0]  (!%p2270_p13), %s2264_s9, 2048, %s2266_s18, %s2274_s25, %s2125_s10, %s2125_s10, %s2126_s11  }
  0x4d   : > { %p2673_p3 = scmp.ne.s32.totalorder %s2667_s24, 0 }
  0x4f   : > { %214 = sbr.rel (%p2673_p3) target bundleno = 465 (0x1d1), region = 32 }
  0x56   : > { %s2308_s30 = sand.u32 1, %s2106_s13   ;;  %p2674_p7 = scmp.ne.s32.totalorder %s2665_s22, 0 }
  0x57   : > { %s1435_s29 = sshll.u32 %s2308_s30, 7  ;;  %s217_s7 = scalar_lea.sflag [#allocation4], %s2308_s30 }
  0x58   : > { %s2314_s19 = scalar_lea.vmem [#allocation3], %s1435_s29 }
  0x59   : > { %2089 = dma.done.wait (%p2674_p7), %s217_s7, 2048  }
  0x5a   : > { %2091 = vsyncadd (%p2674_p7), %s217_s7, 4294965248  ;;  %p2675_p13 = scmp.ne.s32.totalorder %s2663_s20, 0 }
  0x5c   : > { %2093 = dma.done.wait (%p2675_p13), [#allocation7], 1024  }
  0x5d   : > { %2095 = vsyncadd (%p2675_p13), [#allocation7], 4294966272  ;;  %v1826_v0 = vld [vmem:[#allocation6] sm:$0xff]   ;;  %v1827_v1 = vld [vmem:[#allocation6 + $0x8] sm:$0xff]   ;;  %s2469_s24 = scalar_lea.vmem [#allocation8], %s1435_s29  ;;  %s1565_s10 = sshll.u32 %s2114_s15, 11 }
  0x5e   : > { %1685 = vmatprep.subr.bf16.mxu0 %v1826_v0  ;;  %1733 = vmatprep.subr.bf16.mxu1 %v1826_v0  ;;  %v1828_v2 = vld [vmem:[#allocation6 + $0x10] sm:$0xff]   ;;  %v1829_v3 = vld [vmem:[#allocation6 + $0x18] sm:$0xff]   ;;  %v1834_v4 = vld [vmem:[%s2314_s19] sm:$0xff]   ;;  %s1311_s11 = sshll.u32 %s2469_s24, 4  ;;  %s2601_s25 = scalar_lea.hbm %s2656_s3, %s1565_s10  ;;  %s2603_s11 = int_to_ptr.vmem [resolvable:$true] %s1311_s11 }
  0x5f   : > { %1686 = vmatpush3.bf16.msra.mxu0 %v1826_v0  ;;  %1741 = vmatpush3.bf16.msra.mxu1 %v1826_v0  ;;  %v1835_v5 = vld [vmem:[%s2314_s19 + $0x40] sm:$0xff]   ;;  %v1831_v7 = vld [vmem:[#allocation6 + $0x28] sm:$0xff]   ;;  %v1832_v8 = vld [vmem:[#allocation6 + $0x30] sm:$0xff]   ;;  %s1297_s15 = scalar_lea.sflag [#allocation5], %s2308_s30  ;;  %s2036_s8 = scalar_lea.vmem %s2603_s11, 2048 }
  0x60   : > { %1687 = vmatprep.subr.bf16.mxu0 %v1827_v1  ;;  %1734 = vmatprep.subr.bf16.mxu1 %v1827_v1  ;;  %v1830_v6 = vld [vmem:[#allocation6 + $0x20] sm:$0xff]   ;;  %v1833_v9 = vld [vmem:[#allocation6 + $0x38] sm:$0xff]   ;;  %v1836_v10 = vld [vmem:[%s2314_s19 + $0x8] sm:$0xff]   ;;  %p2037_p4 = scmp.ne.s32.totalorder %s2603_s11, %s2036_s8  ;;  %s2128_s26 = smov [#allocation8]  }
  0x61   : > { %1701 = vmatprep.mubr.bf16.mxu0 %v1834_v4  ;;  %1717 = vmatprep.mubr.bf16.mxu1 %v1835_v5  ;;  %v1837_v11 = vld [vmem:[%s2314_s19 + $0x48] sm:$0xff]   ;;  %v1838_v12 = vld [vmem:[%s2314_s19 + $0x10] sm:$0xff]   ;;  %v1840_v14 = vld [vmem:[%s2314_s19 + $0x18] sm:$0xff]   ;;  %s2040_s21 = sshll.u32 %s2128_s26, 4  ;;  %s2041_s21 = int_to_ptr.vmem [resolvable:$false] %s2040_s21 }
  0x62   : > { %v1839_v13 = vld [vmem:[%s2314_s19 + $0x50] sm:$0xff]   ;;  %v1841_v15 = vld [vmem:[%s2314_s19 + $0x58] sm:$0xff]   ;;  %v1842_v16 = vld [vmem:[%s2314_s19 + $0x20] sm:$0xff]   ;;  %p2038_p6 = pnand %p2037_p4, %p2249_p11  ;;  %s2042_s4 = scalar_lea.vmem %s2041_s21, 4096 }
  0x63   : > { %1688 = vmatpush3.bf16.msra.mxu0 %v1827_v1  ;;  %1742 = vmatpush3.bf16.msra.mxu1 %v1827_v1  ;;  %v1843_v17 = vld [vmem:[%s2314_s19 + $0x60] sm:$0xff]   ;;  %v1844_v18 = vld [vmem:[%s2314_s19 + $0x28] sm:$0xff]   ;;  %v1846_v20 = vld [vmem:[%s2314_s19 + $0x30] sm:$0xff]   ;;  %p2043_p12 = scmp.lt.s32.totalorder %s2603_s11, %s2041_s21  ;;  %p2044_p10 = scmp.lt.s32.totalorder %s2042_s4, %s2036_s8 }
  0x64   : > { %1689 = vmatprep.subr.bf16.mxu0 %v1828_v2  ;;  %1735 = vmatprep.subr.bf16.mxu1 %v1828_v2  ;;  %v1845_v19 = vld [vmem:[%s2314_s19 + $0x68] sm:$0xff]   ;;  %v1847_v21 = vld [vmem:[%s2314_s19 + $0x70] sm:$0xff]   ;;  %v1848_v22 = vld [vmem:[%s2314_s19 + $0x38] sm:$0xff]   ;;  %p2039_p8 = pneg %p2038_p6 }
  0x65   : > { %v1849_v23 = vld [vmem:[%s2314_s19 + $0x78] sm:$0xff]   ;;  %v2343_v24 = vld [vmem:[%s2655_s2] ss:$0 sm:$0xff]  ;;  %p2045_p0 = por %p2044_p10, %p2043_p12 }
  0x67   : > { %1690 = vmatpush3.bf16.msra.mxu0 %v1828_v2  ;;  %1743 = vmatpush3.bf16.msra.mxu1 %v1828_v2  ;;  %p2046_p5 = pnand %p2045_p0, %p2039_p8 }
  0x68   : > { %1691 = vmatprep.subr.bf16.mxu0 %v1829_v3  ;;  %1736 = vmatprep.subr.bf16.mxu1 %v1829_v3 }
  0x6b   : > { %1692 = vmatpush3.bf16.msra.mxu0 %v1829_v3  ;;  %1744 = vmatpush3.bf16.msra.mxu1 %v1829_v3 }
  0x6c   : > { %1693 = vmatprep.subr.bf16.mxu0 %v1830_v6  ;;  %1737 = vmatprep.subr.bf16.mxu1 %v1830_v6 }
  0x6f   : > { %1694 = vmatpush3.bf16.msra.mxu0 %v1830_v6  ;;  %1745 = vmatpush3.bf16.msra.mxu1 %v1830_v6 }
  0x70   : > { %1695 = vmatprep.subr.bf16.mxu0 %v1831_v7  ;;  %1738 = vmatprep.subr.bf16.mxu1 %v1831_v7 }
  0x73   : > { %1696 = vmatpush3.bf16.msra.mxu0 %v1831_v7  ;;  %1746 = vmatpush3.bf16.msra.mxu1 %v1831_v7 }
  0x74   : > { %1697 = vmatprep.subr.bf16.mxu0 %v1832_v8  ;;  %1739 = vmatprep.subr.bf16.mxu1 %v1832_v8 }
  0x77   : > { %1698 = vmatpush3.bf16.msra.mxu0 %v1832_v8  ;;  %1747 = vmatpush3.bf16.msra.mxu1 %v1832_v8 }
  0x78   : > { %1699 = vmatprep.subr.bf16.mxu0 %v1833_v9  ;;  %1740 = vmatprep.subr.bf16.mxu1 %v1833_v9 }
  0x7b   : > { %1700 = vmatpush3.bf16.msra.mxu0 %v1833_v9  ;;  %1748 = vmatpush3.bf16.msra.mxu1 %v1833_v9 }
  0x7e   : > { %1702 = vmatmul.mubr.bf16.vlgmr.msra.gmra.mrb[0].mxu0 %v1836_v10  ;;  %1718 = vmatmul.mubr.bf16.vlgmr.msra.gmra.mrb[0].mxu1 %v1837_v11 }
  0x7f   : > { %1705 = vmatprep.mubr.bf16.mxu0 %v1838_v12  ;;  %1721 = vmatprep.mubr.bf16.mxu1 %v1839_v13 }
  0x86   : > { %1706 = vmatmul.mubr.bf16.gmra.mrb[4].mxu0 %v1840_v14  ;;  %1722 = vmatmul.mubr.bf16.gmra.mrb[4].mxu1 %v1841_v15 }
  0x87   : > { %1709 = vmatprep.mubr.bf16.mxu0 %v1842_v16  ;;  %1725 = vmatprep.mubr.bf16.mxu1 %v1843_v17 }
  0x8e   : > { %1710 = vmatmul.mubr.bf16.gmra.mrb[8].mxu0 %v1844_v18  ;;  %1726 = vmatmul.mubr.bf16.gmra.mrb[8].mxu1 %v1845_v19 }
  0x8f   : > { %1713 = vmatprep.mubr.bf16.mxu0 %v1846_v20  ;;  %1729 = vmatprep.mubr.bf16.mxu1 %v1847_v21 }
  0x96   : > { %1714 = vmatmul.mubr.bf16.gmra.mrb[12].mxu0 %v1848_v22  ;;  %1730 = vmatmul.mubr.bf16.gmra.mrb[12].mxu1 %v1849_v23 }
 0x151   : > { %v1703_v25 = vpop.f32.mrb[0].mxu0  ;;  %v1719_v26 = vpop.f32.mrb[0].mxu1 }
 0x152   : > { %v2346_v27 = vadd.f32 %v1703_v25, %v2343_v24  ;;  %v2349_v28 = vadd.f32 %v1719_v26, %v2343_v24  ;;  %v551_v29 = vpop.f32.mrb[1].mxu0  ;;  %v615_v30 = vpop.f32.mrb[1].mxu1 }
 0x153   : > { %v2352_v31 = vadd.f32 %v2343_v24, %v551_v29  ;;  %v2355_v32 = vadd.f32 %v2343_v24, %v615_v30  ;;  %v1704_v33 = vpop.f32.mrb[2].mxu0  ;;  %v1720_v34 = vpop.f32.mrb[2].mxu1 }
 0x154   : > { %v818_v35 = vmin.f32 %v2346_v27, 20.0  ;;  %v834_v36 = vmin.f32 %v2349_v28, 20.0  ;;  %v2360_v37 = vadd.f32 %v1704_v33, %v2343_v24  ;;  %v2363_v38 = vadd.f32 %v1720_v34, %v2343_v24  ;;  %v554_v39 = vpop.f32.mrb[3].mxu0  ;;  %v618_v40 = vpop.f32.mrb[3].mxu1 }
 0x155   : > { %v816_v41 = vmin.f32 %v2352_v31, 20.0  ;;  %v832_v42 = vmin.f32 %v2355_v32, 20.0  ;;  %v2368_v43 = vadd.f32 %v2343_v24, %v554_v39  ;;  %v2371_v44 = vadd.f32 %v2343_v24, %v618_v40 }
 0x156   : > { %v852_v45 = vmul.f32 1.442695, %v818_v35  ;;  %v884_v46 = vmul.f32 1.442695, %v834_v36  ;;  %v819_v47 = vmin.f32 %v2360_v37, 20.0  ;;  %v835_v48 = vmin.f32 %v2363_v38, 20.0 }
 0x157   : > { %v848_v49 = vmul.f32 1.442695, %v816_v41  ;;  %v880_v50 = vmul.f32 1.442695, %v832_v42  ;;  %v817_v51 = vmin.f32 %v2368_v43, 20.0  ;;  %v833_v52 = vmin.f32 %v2371_v44, 20.0 }
 0x158   : > { %1850 = vpow2.f32 %v852_v45  ;;  %v854_v53 = vmul.f32 1.442695, %v819_v47  ;;  %v886_v54 = vmul.f32 1.442695, %v835_v48 }
 0x159   : > { %1852 = vpow2.f32 %v884_v46  ;;  %v1707_v55 = vpop.f32.mrb[4].mxu0  ;;  %v1723_v56 = vpop.f32.mrb[4].mxu1  ;;  %v850_v57 = vmul.f32 1.442695, %v817_v51  ;;  %v882_v62 = vmul.f32 1.442695, %v833_v52 }
 0x15a   : > { %1854 = vpow2.f32 %v848_v49  ;;  %v2378_v58 = vadd.f32 %v1707_v55, %v2343_v24  ;;  %v2381_v59 = vadd.f32 %v1723_v56, %v2343_v24  ;;  %v567_v60 = vpop.f32.mrb[5].mxu0  ;;  %v631_v61 = vpop.f32.mrb[5].mxu1 }
 0x15b   : > { %1856 = vpow2.f32 %v880_v50  ;;  %v2384_v63 = vadd.f32 %v2343_v24, %v567_v60  ;;  %v2387_v0 = vadd.f32 %v2343_v24, %v631_v61  ;;  %v1708_v1 = vpop.f32.mrb[6].mxu0  ;;  %v1724_v2 = vpop.f32.mrb[6].mxu1 }
 0x15c   : > { %1858 = vpow2.f32 %v854_v53  ;;  %v822_v3 = vmin.f32 %v2378_v58, 20.0  ;;  %v838_v4 = vmin.f32 %v2381_v59, 20.0  ;;  %v2392_v5 = vadd.f32 %v1708_v1, %v2343_v24  ;;  %v570_v6 = vpop.f32.mrb[7].mxu0  ;;  %v634_v7 = vpop.f32.mrb[7].mxu1 }
 0x15d   : > { %2676 = vst [vmem:[#allocation12_spill] sm:$0xff] %v2387_v0  ;;  %1860 = vpow2.f32 %v886_v54  ;;  %v820_v8 = vmin.f32 %v2384_v63, 20.0  ;;  %v836_v9 = vmin.f32 %v2387_v0, 20.0  ;;  %v2397_v10 = vadd.f32 %v1724_v2, %v2343_v24 }
 0x15e   : > { %1862 = vpow2.f32 %v850_v57  ;;  %v860_v11 = vmul.f32 1.442695, %v822_v3  ;;  %v892_v12 = vmul.f32 1.442695, %v838_v4  ;;  %v823_v13 = vmin.f32 %v2392_v5, 20.0 }
 0x15f   : > { %1864 = vpow2.f32 %v882_v62  ;;  %v856_v14 = vmul.f32 1.442695, %v820_v8  ;;  %v888_v15 = vmul.f32 1.442695, %v836_v9  ;;  %v839_v16 = vmin.f32 %v2397_v10, 20.0 }
 0x160   : > { %1866 = vpow2.f32 %v860_v11  ;;  %v2402_v17 = vadd.f32 %v2343_v24, %v570_v6  ;;  %v2405_v18 = vadd.f32 %v2343_v24, %v634_v7  ;;  %v862_v22 = vmul.f32 1.442695, %v823_v13 }
 0x161   : > { %1868 = vpow2.f32 %v892_v12  ;;  %v1711_v19 = vpop.f32.mrb[8].mxu0  ;;  %v1727_v20 = vpop.f32.mrb[8].mxu1  ;;  %v894_v34 = vmul.f32 1.442695, %v839_v16 }
 0x162   : > { %2677 = vst [vmem:[#allocation13_spill] sm:$0xff] %v2405_v18  ;;  %v1851_v21 = vpop.eup %1850  ;;  %1870 = vpow2.f32 %v856_v14  ;;  %v821_v23 = vmin.f32 %v2402_v17, 20.0  ;;  %v837_v25 = vmin.f32 %v2405_v18, 20.0  ;;  %v583_v26 = vpop.f32.mrb[9].mxu0  ;;  %v2416_v42 = vadd.f32 %v1711_v19, %v2343_v24 }
 0x163   : > { %v2409_v29 = vpop.f32.mrb[9].mxu1  ;;  %v1853_v30 = vpop.eup %1852  ;;  %v914_v33 = vadd.f32 1.0, %v1851_v21  ;;  %1872 = vpow2.f32 %v888_v15  ;;  %v2421_v49 = vadd.f32 %v1727_v20, %v2343_v24  ;;  %v2424_v50 = vadd.f32 %v2343_v24, %v583_v26 }
 0x164   : > { %v2411_v35 = vpop.f32.mrb[10].mxu0  ;;  %v2413_v36 = vpop.f32.mrb[10].mxu1  ;;  %v930_v40 = vadd.f32 1.0, %v1853_v30  ;;  %v858_v41 = vmul.f32 1.442695, %v821_v23  ;;  %1874 = vpow2.f32 %v862_v22 }
 0x165   : > { %v1855_v39 = vpop.eup %1854  ;;  %v2418_v45 = vpop.f32.mrb[11].mxu0  ;;  %v946_v47 = vmul.f32 %v914_v33, %v914_v33  ;;  %v2428_v55 = vmul.f32 1.442695, %v837_v25  ;;  %1876 = vpow2.f32 %v894_v34 }
 0x166   : > { %v1857_v46 = vpop.eup %1856  ;;  %v912_v48 = vadd.f32 1.0, %v1855_v39  ;;  %v2426_v51 = vpop.f32.mrb[11].mxu1  ;;  %v962_v53 = vmul.f32 %v930_v40, %v930_v40  ;;  %1878 = vpow2.f32 %v858_v41 }
 0x167   : > { %v1859_v52 = vpop.eup %1858  ;;  %v928_v54 = vadd.f32 1.0, %v1857_v46  ;;  %v1010_v57 = vadd.f32 1.0, %v946_v47  ;;  %v1465_v21 = vadd.f32 -1.0, %v946_v47 }
 0x168   : > { %v1861_v56 = vpop.eup %1860  ;;  %v944_v60 = vmul.f32 %v912_v48, %v912_v48  ;;  %v915_v61 = vadd.f32 1.0, %v1859_v52  ;;  %v1026_v1 = vadd.f32 1.0, %v962_v53  ;;  %v1481_v33 = vadd.f32 -1.0, %v962_v53 }
 0x169   : > { %v1863_v62 = vpop.eup %1862  ;;  %v960_v2 = vmul.f32 %v928_v54, %v928_v54  ;;  %v931_v3 = vadd.f32 1.0, %v1861_v56  ;;  %1880 = vrcp.f32 %v1010_v57  ;;  %v2431_v9 = vpop.f32.mrb[12].mxu0 }
 0x16a   : > { %v1865_v4 = vpop.eup %1864  ;;  %v1008_v6 = vadd.f32 1.0, %v944_v60  ;;  %v947_v7 = vmul.f32 %v915_v61, %v915_v61  ;;  %v2433_v11 = vpop.f32.mrb[12].mxu1  ;;  %1882 = vrcp.f32 %v1026_v1  ;;  %v913_v23 = vadd.f32 1.0, %v1863_v62 }
 0x16b   : > { %v1867_v12 = vpop.eup %1866  ;;  %v1024_v13 = vadd.f32 1.0, %v960_v2  ;;  %v963_v14 = vmul.f32 %v931_v3, %v931_v3  ;;  %v2436_v16 = vpop.f32.mrb[13].mxu0  ;;  %v929_v39 = vadd.f32 1.0, %v1865_v4  ;;  %v1463_v61 = vadd.f32 -1.0, %v944_v60 }
 0x16c   : > { %v2438_v19 = vpop.f32.mrb[13].mxu1  ;;  %v1869_v20 = vpop.eup %1868  ;;  %1884 = vrcp.f32 %v1008_v6  ;;  %v1011_v22 = vadd.f32 1.0, %v947_v7  ;;  %v945_v48 = vmul.f32 %v913_v23, %v913_v23  ;;  %v918_v47 = vadd.f32 1.0, %v1867_v12 }
 0x16d   : > { %v2440_v25 = vpop.f32.mrb[14].mxu0  ;;  %v2442_v26 = vpop.f32.mrb[14].mxu1  ;;  %1886 = vrcp.f32 %v1024_v13  ;;  %v1027_v34 = vadd.f32 1.0, %v963_v14  ;;  %v934_v52 = vadd.f32 1.0, %v1869_v20  ;;  %v961_v54 = vmul.f32 %v929_v39, %v929_v39 }
 0x16e   : > { %2678 = vst [vmem:[#allocation14_spill] sm:$0xff] %v2442_v26  ;;  %v1871_v30 = vpop.eup %1870  ;;  %v2444_v40 = vpop.f32.mrb[15].mxu0  ;;  %1888 = vrcp.f32 %v1011_v22  ;;  %v1009_v62 = vadd.f32 1.0, %v945_v48  ;;  %v950_v1 = vmul.f32 %v918_v47, %v918_v47  ;;  %v1479_v6 = vadd.f32 -1.0, %v960_v2 }
 0x16f   : > { %2679 = vst [vmem:[#allocation15_spill] sm:$0xff] %v2444_v40  ;;  %v2446_v41 = vpop.f32.mrb[15].mxu1  ;;  %v1873_v46 = vpop.eup %1872  ;;  %1890 = vrcp.f32 %v1027_v34  ;;  %v916_v56 = vadd.f32 1.0, %v1871_v30  ;;  %v966_v53 = vmul.f32 %v934_v52, %v934_v52  ;;  %v1025_v4 = vadd.f32 1.0, %v961_v54 }
 0x170   : > { %2680 = vst [vmem:[#allocation16_spill] sm:$0xff] %v2446_v41  ;;  %v932_v57 = vadd.f32 1.0, %v1873_v46  ;;  %v1875_v3 = vpop.eup %1874  ;;  %v1466_v41 = vadd.f32 -1.0, %v947_v7  ;;  %v1482_v22 = vadd.f32 -1.0, %v963_v14  ;;  %1892 = vrcp.f32 %v1009_v62 }
 0x171   : > { %v948_v13 = vmul.f32 %v916_v56, %v916_v56  ;;  %v1877_v8 = vpop.eup %1876  ;;  %v1014_v12 = vadd.f32 1.0, %v950_v1  ;;  %v1464_v23 = vadd.f32 -1.0, %v945_v48  ;;  %1894 = vrcp.f32 %v1025_v4 }
 0x172   : > { %v2448_v15 = vmul.f32 %v932_v57, %v932_v57  ;;  %v1879_v20 = vpop.eup %1878  ;;  %v1030_v30 = vadd.f32 1.0, %v966_v53  ;;  %v1480_v39 = vadd.f32 -1.0, %v961_v54  ;;  %v1469_v46 = vadd.f32 -1.0, %v950_v1 }
 0x173   : > { %v1012_v34 = vadd.f32 1.0, %v948_v13  ;;  %v1881_v60 = vpop.eup %1880  ;;  %1896 = vrcp.f32 %v1014_v12  ;;  %v919_v47 = vadd.f32 1.0, %v1875_v3  ;;  %v935_v57 = vadd.f32 1.0, %v1877_v8 }
 0x174   : > { %v1883_v2 = vpop.eup %1882  ;;  %v1074_v52 = vmul.f32 %v1881_v60, %v1465_v21  ;;  %1898 = vrcp.f32 %v1030_v30  ;;  %v1028_v56 = vadd.f32 1.0, %v2448_v15  ;;  %v917_v18 = vadd.f32 1.0, %v1879_v20 }
 0x175   : > { %v1090_v14 = vmul.f32 %v1883_v2, %v1481_v33  ;;  %1900 = vrcp.f32 %v1012_v34  ;;  %v951_v62 = vmul.f32 %v919_v47, %v919_v47  ;;  %v1485_v40 = vadd.f32 -1.0, %v966_v53 }
 0x176   : > { %v1885_v7 = vpop.eup %1884  ;;  %v1467_v0 = vadd.f32 -1.0, %v948_v13  ;;  %v967_v26 = vmul.f32 %v935_v57, %v935_v57  ;;  %v1106_v1 = vmul.f32 %v1074_v52, %v2346_v27  ;;  %v2681_v21 = vmin.f32 %v2416_v42, 20.0 }
 0x177   : > { %v1887_v48 = vpop.eup %1886  ;;  %v1072_v4 = vmul.f32 %v1885_v7, %v1463_v61  ;;  %v1015_v12 = vadd.f32 1.0, %v951_v62  ;;  %v1122_v8 = vmul.f32 %v1090_v14, %v2349_v28  ;;  %1902 = vrcp.f32 %v1028_v56 }
 0x178   : > { %v1889_v54 = vpop.eup %1888  ;;  %v1088_v3 = vmul.f32 %v1887_v48, %v1479_v6  ;;  %v868_v30 = vmul.f32 1.442695, %v2681_v21  ;;  %v1031_v34 = vadd.f32 1.0, %v967_v26  ;;  %v949_v53 = vmul.f32 %v917_v18, %v917_v18 }
 0x179   : > { %v1891_v60 = vpop.eup %1890  ;;  %v1075_v33 = vmul.f32 %v1889_v54, %v1466_v41  ;;  %v1104_v20 = vmul.f32 %v1072_v4, %v2352_v31  ;;  %1904 = vrcp.f32 %v1015_v12  ;;  %v2682_v27 = vmin.f32 %v2421_v49, 20.0 }
 0x17a   : > { %v1091_v61 = vmul.f32 %v1891_v60, %v1482_v22  ;;  %1906 = vrcp.f32 %v1031_v34  ;;  %v824_v47 = vmin.f32 %v2424_v50, 20.0  ;;  %v1893_v2 = vpop.eup %1892  ;;  %v1120_v28 = vmul.f32 %v1088_v3, %v2355_v32 }
 0x17b   : > { %v1107_v13 = vmul.f32 %v1075_v33, %v2360_v37  ;;  %v900_v6 = vmul.f32 1.442695, %v2682_v27  ;;  %v1013_v52 = vadd.f32 1.0, %v949_v53  ;;  %1908 = vpow2.f32 %v2428_v55  ;;  %v1895_v31 = vpop.eup %1894 }
 0x17c   : > { %v1123_v41 = vmul.f32 %v1091_v61, %v2363_v38  ;;  %v1073_v18 = vmul.f32 %v1893_v2, %v1464_v23  ;;  %1910 = vpow2.f32 %v868_v30  ;;  %v864_v37 = vmul.f32 1.442695, %v824_v47 }
 0x17d   : > { %v1574_v22 = vpack.c.bf16 %v1107_v13, %v1106_v1  ;;  %v1897_v56 = vpop.eup %1896  ;;  %v1089_v7 = vmul.f32 %v1895_v31, %v1480_v39  ;;  %1912 = vrcp.f32 %v1013_v52  ;;  %v2465_v14 = vadd.f32 %v2343_v24, %v2409_v29 }
 0x17e   : > { %v1614_v57 = vpack.c.bf16 %v1123_v41, %v1122_v8  ;;  %v1899_v48 = vpop.eup %1898  ;;  %v1105_v32 = vmul.f32 %v1073_v18, %v2368_v43  ;;  %v1078_v38 = vmul.f32 %v1897_v56, %v1469_v46  ;;  %1914 = vpow2.f32 %v900_v6 }
 0x17f   : > { %1646 = vst [vmem:[%s2469_s24 + $0x8] sm:$0xff] %v1574_v22   ;;  %v2475_v55 = vadd.f32 %v2411_v35, %v2343_v24  ;;  %v1901_v23 = vpop.eup %1900  ;;  %v1121_v29 = vmul.f32 %v1089_v7, %v2371_v44  ;;  %v1094_v39 = vmul.f32 %v1899_v48, %v1485_v40  ;;  %1916 = vpow2.f32 %v864_v37 }
 0x180   : > { %1654 = vst [vmem:[%s2469_s24 + $0x48] sm:$0xff] %v1614_v57   ;;  %v840_v4 = vmin.f32 %v2465_v14, 20.0  ;;  %v1569_v54 = vpack.c.bf16 %v1105_v32, %v1104_v20  ;;  %v1470_v1 = vadd.f32 -1.0, %v951_v62  ;;  %v1486_v3 = vadd.f32 -1.0, %v967_v26 }
 0x181   : > { %v827_v43 = vmin.f32 %v2475_v55, 20.0  ;;  %v1609_v46 = vpack.c.bf16 %v1121_v29, %v1120_v28  ;;  %v1076_v12 = vmul.f32 %v1901_v23, %v1467_v0  ;;  %v1468_v21 = vadd.f32 -1.0, %v949_v53  ;;  %v2481_v30 = vpop.eup %1902 }
 0x182   : > { %v896_v35 = vmul.f32 1.442695, %v840_v4  ;;  %1570 = vst [vmem:[%s2469_s24] sm:$0xff] %v1569_v54   ;;  %v1110_v60 = vmul.f32 %v1078_v38, %v2378_v58  ;;  %v2487_v40 = vadd.f32 %v2413_v36, %v2343_v24  ;;  %v2491_v62 = vadd.f32 %v2343_v24, %v2418_v45 }
 0x183   : > { %v870_v44 = vmul.f32 1.442695, %v827_v43  ;;  %v1905_v26 = vpop.eup %1904  ;;  %1653 = vst [vmem:[%s2469_s24 + $0x40] sm:$0xff] %v1609_v46   ;;  %v1126_v0 = vmul.f32 %v1094_v39, %v2381_v59  ;;  %v2497_v8 = vadd.f32 %v2343_v24, %v2426_v51  ;;  %v2501_v58 = vadd.f32 %v2431_v9, %v2343_v24 }
 0x184   : > { %1918 = vpow2.f32 %v896_v35  ;;  %v1907_v33 = vpop.eup %1906  ;;  %v1079_v36 = vmul.f32 %v1905_v26, %v1470_v1  ;;  %v843_v34 = vmin.f32 %v2487_v40, 20.0  ;;  %v825_v45 = vmin.f32 %v2491_v62, 20.0 }
 0x185   : > { %1920 = vpow2.f32 %v870_v44  ;;  %v1909_v20 = vpop.eup %1908  ;;  %v1108_v61 = vmul.f32 %v1076_v12, %v2384_v63  ;;  %v1095_v59 = vmul.f32 %v1907_v33, %v1486_v3  ;;  %v841_v53 = vmin.f32 %v2497_v8, 20.0  ;;  %v2683_v33 = vld [vmem:[#allocation14_spill] sm:$0xff] }
 0x186   : > { %v830_v51 = vmin.f32 %v2501_v58, 20.0  ;;  %v1911_v13 = vpop.eup %1910  ;;  %v1111_v27 = vmul.f32 %v1079_v36, %v2392_v5  ;;  %v933_v9 = vadd.f32 1.0, %v1909_v20  ;;  %v902_v6 = vmul.f32 1.442695, %v843_v34 }
 0x187   : > { %v866_v47 = vmul.f32 1.442695, %v825_v45  ;;  %v1913_v2 = vpop.eup %1912  ;;  %v1127_v28 = vmul.f32 %v1095_v59, %v2397_v10  ;;  %v922_v41 = vadd.f32 1.0, %v1911_v13  ;;  %v898_v52 = vmul.f32 1.442695, %v841_v53 }
 0x188   : > { %v2512_v63 = vadd.f32 %v2433_v11, %v2343_v24  ;;  %v1915_v31 = vpop.eup %1914  ;;  %v1584_v22 = vpack.c.bf16 %v1111_v27, %v1110_v60  ;;  %v1077_v18 = vmul.f32 %v1913_v2, %v1468_v21  ;;  %v965_v37 = vmul.f32 %v933_v9, %v933_v9 }
 0x189   : > { %1922 = vpow2.f32 %v902_v6  ;;  %v1917_v5 = vpop.eup %1916  ;;  %v1624_v56 = vpack.c.bf16 %v1127_v28, %v1126_v0  ;;  %v2514_v57 = vmul.f32 %v922_v41, %v922_v41  ;;  %v938_v7 = vadd.f32 1.0, %v1915_v31 }
 0x18a   : > { %1924 = vpow2.f32 %v866_v47  ;;  %1648 = vst [vmem:[%s2469_s24 + $0x18] sm:$0xff] %v1584_v22   ;;  %v1109_v10 = vmul.f32 %v1077_v18, %v2402_v17  ;;  %v1029_v48 = vadd.f32 1.0, %v965_v37  ;;  %v920_v32 = vadd.f32 1.0, %v1917_v5 }
 0x18b   : > { %v876_v11 = vmul.f32 1.442695, %v830_v51  ;;  %1656 = vst [vmem:[%s2469_s24 + $0x58] sm:$0xff] %v1624_v56   ;;  %v1018_v38 = vadd.f32 1.0, %v2514_v57  ;;  %v2520_v23 = vmul.f32 %v938_v7, %v938_v7  ;;  %1926 = vpow2.f32 %v898_v52  ;;  %v2684_v52 = vld [vmem:[#allocation12_spill] sm:$0xff] }
 0x18c   : > { %v1579_v29 = vpack.c.bf16 %v1109_v10, %v1108_v61  ;;  %1928 = vrcp.f32 %v1029_v48  ;;  %v2522_v39 = vmul.f32 %v920_v32, %v920_v32  ;;  %v846_v4 = vmin.f32 %v2512_v63, 20.0  ;;  %v2685_v10 = vld [vmem:[#allocation15_spill] sm:$0xff]  ;;  %v2686_v48 = vld [vmem:[#allocation13_spill] sm:$0xff] }
 0x18d   : > { %v2527_v17 = vadd.f32 %v2343_v24, %v2436_v16  ;;  %v1483_v3 = vadd.f32 -1.0, %v2448_v15  ;;  %v1034_v43 = vadd.f32 1.0, %v2520_v23  ;;  %1930 = vpow2.f32 %v876_v11 }
 0x18e   : > { %v1919_v54 = vpop.eup %1918  ;;  %1647 = vst [vmem:[%s2469_s24 + $0x10] sm:$0xff] %v1579_v29   ;;  %v1016_v12 = vadd.f32 1.0, %v2522_v39  ;;  %v908_v35 = vmul.f32 1.442695, %v846_v4  ;;  %1932 = vrcp.f32 %v1018_v38  ;;  %v2538_v16 = vadd.f32 %v2343_v24, %v2438_v19  ;;  %v2687_v4 = vld [vmem:[#allocation16_spill] sm:$0xff] }
 0x18f   : > { %v1921_v1 = vpop.eup %1920  ;;  %v936_v46 = vadd.f32 1.0, %v1919_v54  ;;  %v828_v60 = vmin.f32 %v2527_v17, 20.0  ;;  %v2542_v15 = vadd.f32 %v2440_v25, %v2343_v24  ;;  %v2546_v36 = vadd.f32 %v2683_v33, %v2343_v24 }
 0x190   : > { %v923_v21 = vadd.f32 1.0, %v1921_v1  ;;  %1934 = vpow2.f32 %v908_v35  ;;  %v1092_v45 = vmul.f32 %v2481_v30, %v1483_v3  ;;  %v844_v20 = vmin.f32 %v2538_v16, 20.0 }
 0x191   : > { %v2534_v44 = vmul.f32 %v936_v46, %v936_v46  ;;  %v872_v0 = vmul.f32 1.442695, %v828_v60  ;;  %1936 = vrcp.f32 %v1034_v43  ;;  %v831_v19 = vmin.f32 %v2542_v15, 20.0 }
 0x192   : > { %v955_v26 = vmul.f32 %v923_v21, %v923_v21  ;;  %1938 = vrcp.f32 %v1016_v12  ;;  %v904_v13 = vmul.f32 1.442695, %v844_v20  ;;  %v1484_v6 = vadd.f32 -1.0, %v965_v37 }
 0x193   : > { %v1923_v34 = vpop.eup %1922  ;;  %v1032_v25 = vadd.f32 1.0, %v2534_v44  ;;  %1940 = vpow2.f32 %v872_v0  ;;  %v878_v27 = vmul.f32 1.442695, %v831_v19  ;;  %v847_v30 = vmin.f32 %v2546_v36, 20.0 }
 0x194   : > { %v1925_v61 = vpop.eup %1924  ;;  %v1019_v59 = vadd.f32 1.0, %v955_v26  ;;  %v939_v53 = vadd.f32 1.0, %v1923_v34  ;;  %v1124_v31 = vmul.f32 %v1092_v45, %v2684_v52  ;;  %v2556_v37 = vadd.f32 %v2343_v24, %v2685_v10 }
 0x195   : > { %v921_v51 = vadd.f32 1.0, %v1925_v61  ;;  %v1927_v9 = vpop.eup %1926  ;;  %v910_v38 = vmul.f32 1.442695, %v847_v30  ;;  %v2561_v54 = vadd.f32 %v2343_v24, %v2687_v4  ;;  %v1473_v12 = vadd.f32 -1.0, %v2514_v57 }
 0x196   : > { %1942 = vrcp.f32 %v1019_v59  ;;  %v971_v47 = vmul.f32 %v939_v53, %v939_v53  ;;  %v1929_v2 = vpop.eup %1928  ;;  %v937_v41 = vadd.f32 1.0, %v1927_v9  ;;  %v829_v21 = vmin.f32 %v2556_v37, 20.0 }
 0x197   : > { %v953_v28 = vmul.f32 %v921_v51, %v921_v51  ;;  %1944 = vpow2.f32 %v904_v13  ;;  %v1093_v22 = vmul.f32 %v1929_v2, %v1484_v6  ;;  %v1931_v5 = vpop.eup %1930  ;;  %v1474_v60 = vadd.f32 -1.0, %v955_v26 }
 0x198   : > { %v1035_v18 = vadd.f32 1.0, %v971_v47  ;;  %1946 = vpow2.f32 %v878_v27  ;;  %v969_v7 = vmul.f32 %v937_v41, %v937_v41  ;;  %v926_v11 = vadd.f32 1.0, %v1931_v5  ;;  %v1933_v29 = vpop.eup %1932 }
 0x199   : > { %1948 = vrcp.f32 %v1032_v25  ;;  %v1017_v56 = vadd.f32 1.0, %v953_v28  ;;  %v1125_v32 = vmul.f32 %v1093_v22, %v2686_v48  ;;  %v1082_v34 = vmul.f32 %v1933_v29, %v1473_v12 }
 0x19a   : > { %1950 = vrcp.f32 %v1035_v18  ;;  %v1935_v1 = vpop.eup %1934  ;;  %v1033_v43 = vadd.f32 1.0, %v969_v7  ;;  %v2566_v0 = vmul.f32 %v926_v11, %v926_v11  ;;  %v874_v24 = vmul.f32 1.442695, %v829_v21 }
 0x19b   : > { %1952 = vrcp.f32 %v1017_v56  ;;  %v1619_v3 = vpack.c.bf16 %v1125_v32, %v1124_v31  ;;  %v1937_v46 = vpop.eup %1936  ;;  %v942_v45 = vadd.f32 1.0, %v1935_v1  ;;  %v845_v20 = vmin.f32 %v2561_v54, 20.0 }
 0x19c   : > { %1954 = vpow2.f32 %v910_v38  ;;  %v1939_v35 = vpop.eup %1938  ;;  %v1489_v25 = vadd.f32 -1.0, %v2520_v23  ;;  %v1471_v57 = vadd.f32 -1.0, %v2522_v39  ;;  %v1490_v53 = vadd.f32 -1.0, %v971_v47 }
 0x19d   : > { %1655 = vst [vmem:[%s2469_s24 + $0x50] sm:$0xff] %v1619_v3   ;;  %1956 = vrcp.f32 %v1033_v43  ;;  %v1941_v33 = vpop.eup %1940  ;;  %v1472_v13 = vadd.f32 -1.0, %v953_v28  ;;  %v1022_v26 = vadd.f32 1.0, %v2566_v0  ;;  %v906_v27 = vmul.f32 1.442695, %v845_v20 }
 0x19e   : > { %1958 = vpow2.f32 %v874_v24  ;;  %v1114_v6 = vmul.f32 %v1082_v34, %v2416_v42  ;;  %v1098_v30 = vmul.f32 %v1937_v46, %v1489_v25  ;;  %v974_v41 = vmul.f32 %v942_v45, %v942_v45 }
 0x19f   : > { %v1080_v31 = vmul.f32 %v1939_v35, %v1471_v57  ;;  %v924_v23 = vadd.f32 1.0, %v1941_v33  ;;  %1960 = vpow2.f32 %v906_v27  ;;  %v1487_v28 = vadd.f32 -1.0, %v2534_v44 }
 0x1a0   : > { %v1943_v19 = vpop.eup %1942  ;;  %v1488_v10 = vadd.f32 -1.0, %v969_v7  ;;  %1962 = vrcp.f32 %v1022_v26  ;;  %v1038_v38 = vadd.f32 1.0, %v974_v41  ;;  %v1493_v27 = vadd.f32 -1.0, %v974_v41 }
 0x1a1   : > { %v1945_v61 = vpop.eup %1944  ;;  %v1083_v59 = vmul.f32 %v1943_v19, %v1474_v60  ;;  %v1112_v4 = vmul.f32 %v1080_v31, %v2424_v50  ;;  %v956_v1 = vmul.f32 %v924_v23, %v924_v23 }
 0x1a2   : > { %v1947_v51 = vpop.eup %1946  ;;  %v940_v5 = vadd.f32 1.0, %v1945_v61 }
 0x1a3   : > { %v1949_v9 = vpop.eup %1948  ;;  %v1115_v2 = vmul.f32 %v1083_v59, %v2475_v55  ;;  %v927_v39 = vadd.f32 1.0, %v1947_v51  ;;  %v1130_v55 = vmul.f32 %v1098_v30, %v2421_v49  ;;  %v1020_v60 = vadd.f32 1.0, %v956_v1 }
 0x1a4   : > { %v1951_v52 = vpop.eup %1950  ;;  %v1096_v32 = vmul.f32 %v1949_v9, %v1487_v28  ;;  %v972_v46 = vmul.f32 %v940_v5, %v940_v5 }
 0x1a5   : > { %v1953_v47 = vpop.eup %1952  ;;  %v1594_v22 = vpack.c.bf16 %v1115_v2, %v1114_v6  ;;  %v1099_v18 = vmul.f32 %v1951_v52, %v1490_v53  ;;  %v959_v42 = vmul.f32 %v927_v39, %v927_v39 }
 0x1a6   : > { %v1081_v56 = vmul.f32 %v1953_v47, %v1472_v13  ;;  %v1955_v48 = vpop.eup %1954  ;;  %v1128_v21 = vmul.f32 %v1096_v32, %v2465_v14  ;;  %v1036_v33 = vadd.f32 1.0, %v972_v46  ;;  %v1477_v14 = vadd.f32 -1.0, %v2566_v0 }
 0x1a7   : > { %1650 = vst [vmem:[%s2469_s24 + $0x28] sm:$0xff] %v1594_v22   ;;  %v1131_v11 = vmul.f32 %v1099_v18, %v2487_v40  ;;  %v1957_v29 = vpop.eup %1956  ;;  %v1023_v3 = vadd.f32 1.0, %v959_v42  ;;  %v943_v12 = vadd.f32 1.0, %v1955_v48  ;;  %v1478_v59 = vadd.f32 -1.0, %v959_v42 }
 0x1a8   : > { %v1113_v44 = vmul.f32 %v1081_v56, %v2491_v62  ;;  %v1097_v43 = vmul.f32 %v1957_v29, %v1488_v10  ;;  %v1959_v50 = vpop.eup %1958  ;;  %v1475_v47 = vadd.f32 -1.0, %v956_v1  ;;  %v1491_v22 = vadd.f32 -1.0, %v972_v46 }
 0x1a9   : > { %v1634_v7 = vpack.c.bf16 %v1131_v11, %v1130_v55  ;;  %1964 = vrcp.f32 %v1023_v3  ;;  %v975_v35 = vmul.f32 %v943_v12, %v943_v12  ;;  %v1961_v45 = vpop.eup %1960  ;;  %v925_v24 = vadd.f32 1.0, %v1959_v50 }
 0x1aa   : > { %v1589_v49 = vpack.c.bf16 %v1113_v44, %v1112_v4  ;;  %v1129_v40 = vmul.f32 %v1097_v43, %v2497_v8  ;;  %1966 = vrcp.f32 %v1038_v38  ;;  %v941_v20 = vadd.f32 1.0, %v1961_v45  ;;  %v1963_v19 = vpop.eup %1962 }
 0x1ab   : > { %1658 = vst [vmem:[%s2469_s24 + $0x68] sm:$0xff] %v1634_v7   ;;  %v1039_v34 = vadd.f32 1.0, %v975_v35  ;;  %v957_v61 = vmul.f32 %v925_v24, %v925_v24  ;;  %v1086_v57 = vmul.f32 %v1963_v19, %v1477_v14  ;;  %v1494_v2 = vadd.f32 -1.0, %v975_v35 }
 0x1ac   : > { %1649 = vst [vmem:[%s2469_s24 + $0x20] sm:$0xff] %v1589_v49   ;;  %v1629_v62 = vpack.c.bf16 %v1129_v40, %v1128_v21  ;;  %v973_v8 = vmul.f32 %v941_v20, %v941_v20 }
 0x1ad   : > { %1968 = vrcp.f32 %v1039_v34  ;;  %v1021_v25 = vadd.f32 1.0, %v957_v61  ;;  %v1118_v9 = vmul.f32 %v1086_v57, %v2501_v58  ;;  %v1476_v18 = vadd.f32 -1.0, %v957_v61 }
 0x1ae   : > { %1657 = vst [vmem:[%s2469_s24 + $0x60] sm:$0xff] %v1629_v62   ;;  %1970 = vrcp.f32 %v1020_v60  ;;  %v1037_v53 = vadd.f32 1.0, %v973_v8  ;;  %v1492_v10 = vadd.f32 -1.0, %v973_v8 }
 0x1af   : > { %1972 = vrcp.f32 %v1036_v33 }
 0x1b0   : > { %1974 = vrcp.f32 %v1021_v25 }
 0x1b1   : > { %1976 = vrcp.f32 %v1037_v53 }
 0x1b3   : > { %v1965_v51 = vpop.eup %1964 }
 0x1b4   : > { %v1967_v13 = vpop.eup %1966  ;;  %v1087_v26 = vmul.f32 %v1965_v51, %v1478_v59 }
 0x1b5   : > { %v1102_v30 = vmul.f32 %v1967_v13, %v1493_v27 }
 0x1b6   : > { %v1119_v6 = vmul.f32 %v1087_v26, %v2542_v15 }
 0x1b7   : > { %v1969_v0 = vpop.eup %1968  ;;  %v1134_v28 = vmul.f32 %v1102_v30, %v2512_v63 }
 0x1b8   : > { %v1604_v52 = vpack.c.bf16 %v1119_v6, %v1118_v9  ;;  %v1971_v31 = vpop.eup %1970  ;;  %v1103_v23 = vmul.f32 %v1969_v0, %v1494_v2 }
 0x1b9   : > { %v1973_v39 = vpop.eup %1972  ;;  %v1084_v58 = vmul.f32 %v1971_v31, %v1475_v47 }
 0x1ba   : > { %1652 = vst [vmem:[%s2469_s24 + $0x38] sm:$0xff] %v1604_v52   ;;  %v1135_v41 = vmul.f32 %v1103_v23, %v2546_v36  ;;  %v1975_v15 = vpop.eup %1974  ;;  %v1100_v5 = vmul.f32 %v1973_v39, %v1491_v22 }
 0x1bb   : > { %v1977_v42 = vpop.eup %1976  ;;  %v1085_v48 = vmul.f32 %v1975_v15, %v1476_v18  ;;  %v1116_v63 = vmul.f32 %v1084_v58, %v2527_v17 }
 0x1bc   : > { %v1644_v56 = vpack.c.bf16 %v1135_v41, %v1134_v28  ;;  %v1101_v55 = vmul.f32 %v1977_v42, %v1492_v10  ;;  %v1132_v32 = vmul.f32 %v1100_v5, %v2538_v16 }
 0x1bd   : > { %v1117_v36 = vmul.f32 %v1085_v48, %v2556_v37 }
 0x1be   : > { %1660 = vst [vmem:[%s2469_s24 + $0x78] sm:$0xff] %v1644_v56   ;;  %v1133_v11 = vmul.f32 %v1101_v55, %v2561_v54 }
 0x1bf   : > { %v1599_v38 = vpack.c.bf16 %v1117_v36, %v1116_v63 }
 0x1c0   : > { %v1639_v29 = vpack.c.bf16 %v1133_v11, %v1132_v32 }
 0x1c1   : > { %1651 = vst [vmem:[%s2469_s24 + $0x30] sm:$0xff] %v1599_v38  }
 0x1c2   : > { %1659 = vst [vmem:[%s2469_s24 + $0x70] sm:$0xff] %v1639_v29  }
 0x1c3   : > { %2049 = shalt.err (!%p2046_p5)
}
 0x1c4   : > { %s2050_s6 = scalar_lea.hbm %s2601_s25, 2048  ;;  %s2054_s19 = scalar_lea.hbm %s2656_s3, 16384 }
 0x1c5   : > { %p2051_p9 = scmp.ne.s32.totalorder %s2601_s25, %s2050_s6  ;;  %p2055_p3 = scmp.lt.u32.totalorder %s2601_s25, %s2656_s3 }
 0x1c6   : > { %p2056_p7 = scmp.lt.u32.totalorder %s2054_s19, %s2050_s6  ;;  %p2058_p4 = scmp.lt.u32.totalorder %s2050_s6, %s2601_s25 }
 0x1c7   : > { %p2052_p1 = pnand %p2051_p9, %p2249_p11 }
 0x1c8   : > { %p2057_p13 = por %p2056_p7, %p2055_p3 }
 0x1c9   : > { %p2053_p2 = pneg %p2052_p1 }
 0x1ca   : > { %p2059_p6 = por %p2058_p4, %p2057_p13 }
 0x1cc   : > { %p2060_p8 = pnand %p2059_p6, %p2053_p2 }
 0x1ce   : > { %2063 = shalt.err (!%p2060_p8)
}
 0x1cf   : > { %s2129_s24 = smov 64   ;;  %s2130_s10 = smov 4  }
 0x1d0   : > { %1755 = dma.vmem_to_hbm [thread:$0]  (%p2249_p11), %s2603_s11, 2048, %s2601_s25, %s1297_s15, %s2129_s24, %s2129_s24, %s2130_s10  }
 0x1d1 PF: > { %p1772_p12 = scmp.ge.s32.totalorder %s2122_s17, 2  ;;  %s1326_s9 = sand.u32 1, %s2102_s12  }
 0x1d2   : > { %p2688_p10 = scmp.ne.s32.totalorder %s2666_s23, 0  ;;  %s1327_s18 = scalar_lea.sflag [#allocation5], %s1326_s9 }
 0x1d4   : > { %p1766_p0 = pnand %p1772_p12, %p2688_p10 }
 0x1d6   : > { %2097 = dma.done.wait (!%p1766_p0), %s1327_s18, 2048  }
 0x1d7   : > { %2099 = vsyncadd (!%p1766_p0), %s1327_s18, 4294965248  ;;  %s20_s17 = sadd.s32 1, %s2122_s17   ;;  %s2689_s12 = smov %s2106_s13 }
 0x1d8   : > { %p17_p5 = scmp.ge.s32.totalorder %s20_s17, 10   ;;  %s2690_s13 = smov %s2110_s14 }
 0x1d9   : > { %s2691_s14 = smov %s2258_s5  ;;  %s2692_s15 = smov %s2118_s16 }
 0x1da   : > { %s2693_s16 = smov %s2695_s28  ;;  %19 = sbr.rel (!%p17_p5) target bundleno = 7 (0x7), region = 93 }
 0x1e1   :  { %1332 = vsyncpa [#allocation4], 1 }
 0x1e2   :  { %1334 = vsyncpa [#allocation4 + $0x1], 1 }
 0x1e3   :  { %1335 = vsyncpa [#allocation7], 1 }
 0x1e4   :  { %1336 = vsyncpa [#allocation5], 1 }
 0x1e5   :  { %1338 = vsyncpa [#allocation5 + $0x1], 1 }

</bundles_post_ra>
